<compile_context>
chip_gen: v5e
topology: v5e:2x2
jax: 0.10.0
libtpu: 0.0.40
codegen_flags: <defaults>
</compile_context>

<pallas_src>
import jax
import jax.numpy as jnp
from jax.experimental import pallas as pl
from jax.experimental.pallas import tpu as pltpu

_LANE = 128
_TILE_R = 512          # sublane rows per tile (multiple of 8)
_MAX_TILE_C = 512      # lanes per tile (multiple of 128) -> unmasked full vst
# 512 x 512 f32 tile = 1 MiB; 4 arrays x 2 pipeline buffers = 8 MiB VMEM.

# Below this, pallas_call launch + per-step overhead dominates the add.
_MIN_PALLAS_ELEMS = 1024


def _sum3_kernel(a_ref, b_ref, c_ref, o_ref):
    # Elementwise hot path on the VPU over one VMEM tile; HBM<->VMEM DMAs are
    # double-buffered by the BlockSpec pipeline around this body.
    o_ref[...] = a_ref[...] + b_ref[...] + c_ref[...]


def sum_net(a, b, c):
    """Pallas implementation of SumNet.forward: returns a + b + c."""
    # Match torch broadcasting / type-promotion semantics, then run the
    # lane-dense Pallas path on equal-shape, equal-dtype operands.
    if not (a.shape == b.shape == c.shape and a.dtype == b.dtype == c.dtype):
        out_dtype = jnp.result_type(a, b, c)
        a, b, c = jnp.broadcast_arrays(
            a.astype(out_dtype), b.astype(out_dtype), c.astype(out_dtype))

    orig_shape = a.shape
    total = a.size

    # Tiny-input fast path: let XLA fuse the 3-way add in one pass.
    if total < _MIN_PALLAS_ELEMS:
        return a + b + c

    # Widest lane-dense 2D view reachable via a free (contiguous) reshape.
    tile_c = 0
    for cand in (_MAX_TILE_C, 256, _LANE):
        if total % cand == 0:
            tile_c = cand
            break
    if tile_c == 0:
        # Ragged element count: jnp.pad / concat would re-copy whole arrays in
        # HBM, costing more than the add itself for this bandwidth-bound op.
        # TODO(synk): masked-tail Pallas variant for non-multiple-of-128 sizes.
        return a + b + c

    a2 = a.reshape(-1, tile_c)
    b2 = b.reshape(-1, tile_c)
    c2 = c.reshape(-1, tile_c)
    rows = a2.shape[0]

    # Row tile: full extent for short arrays (always a legal block), otherwise
    # _TILE_R with a pl.cdiv grid — the trailing partial block gets padded
    # reads and masked writes, so no host-side padding is needed.
    tile_r = rows if rows < _TILE_R else _TILE_R
    grid = (pl.cdiv(rows, tile_r),)

    out2 = pl.pallas_call(
        _sum3_kernel,
        out_shape=jax.ShapeDtypeStruct((rows, tile_c), a.dtype),
        grid=grid,
        in_specs=[
            pl.BlockSpec((tile_r, tile_c), lambda i: (i, 0)),
            pl.BlockSpec((tile_r, tile_c), lambda i: (i, 0)),
            pl.BlockSpec((tile_r, tile_c), lambda i: (i, 0)),
        ],
        out_specs=pl.BlockSpec((tile_r, tile_c), lambda i: (i, 0)),
        compiler_params=pltpu.CompilerParams(
            # Independent row tiles: lets Mosaic shard across both v7x
            # TensorCores; neutral on single-TC v5e/v6e.
            dimension_semantics=("parallel",),
        ),
    )(a2, b2, c2)

    return out2.reshape(orig_shape)


if __name__ == "__main__":
    key = jax.random.PRNGKey(0)

    # Small NCHW test shape consistent with the module's intended use.
    shape_small = (2, 4, 16, 16)
    ka, kb, kc, kd = jax.random.split(key, 4)
    a = jax.random.normal(ka, shape_small, dtype=jnp.float32)
    b = jax.random.normal(kb, shape_small, dtype=jnp.float32)
    c = jax.random.normal(kc, shape_small, dtype=jnp.float32)

    d = sum_net(a, b, c)
    jax.block_until_ready(d)
    ref = a + b + c
    assert d.shape == shape_small and d.dtype == jnp.float32
    assert jnp.allclose(d, ref, atol=1e-6, rtol=1e-6)

    # Larger shape to exercise the tiled, pipelined multi-block path.
    shape_big = (8, 16, 64, 128)
    k1, k2, k3 = jax.random.split(kd, 3)
    ab = jax.random.normal(k1, shape_big, dtype=jnp.float32)
    bb = jax.random.normal(k2, shape_big, dtype=jnp.float32)
    cb = jax.random.normal(k3, shape_big, dtype=jnp.float32)

    db = sum_net(ab, bb, cb)
    jax.block_until_ready(db)
    refb = ab + bb + cb
    assert db.shape == shape_big and db.dtype == jnp.float32
    assert jnp.allclose(db, refb, atol=1e-6, rtol=1e-6)

    print("KERNEL_OK")
</pallas_src>

<mosaic_0001>
module attributes {stable_mosaic.version = 11 : i64} {
  func.func @_sum3_kernel(%arg0: i32, %arg1: memref<4x512xf32, #tpu.memory_space<vmem>>, %arg2: memref<4x512xf32, #tpu.memory_space<vmem>>, %arg3: memref<4x512xf32, #tpu.memory_space<vmem>>, %arg4: memref<4x512xf32, #tpu.memory_space<vmem>>) attributes {dimension_semantics = [#tpu.dimension_semantics<parallel>], iteration_bounds = array<i64: 1>, scalar_prefetch = 0 : i64, scratch_operands = 0 : i64, tpu.core_type = #tpu.core_type<tc>, window_params = [{transform_indices = @transform_0, window_bounds = array<i64: 4, 512>}, {transform_indices = @transform_1, window_bounds = array<i64: 4, 512>}, {transform_indices = @transform_2, window_bounds = array<i64: 4, 512>}, {transform_indices = @transform_3, window_bounds = array<i64: 4, 512>}]} {
    %c0 = arith.constant 0 : index
    %c0_0 = arith.constant 0 : index
    %0 = vector.load %arg1[%c0, %c0_0] : memref<4x512xf32, #tpu.memory_space<vmem>>, vector<4x512xf32>
    %c0_1 = arith.constant 0 : index
    %c0_2 = arith.constant 0 : index
    %1 = vector.load %arg2[%c0_1, %c0_2] : memref<4x512xf32, #tpu.memory_space<vmem>>, vector<4x512xf32>
    %2 = arith.addf %0, %1 : vector<4x512xf32>
    %c0_3 = arith.constant 0 : index
    %c0_4 = arith.constant 0 : index
    %3 = vector.load %arg3[%c0_3, %c0_4] : memref<4x512xf32, #tpu.memory_space<vmem>>, vector<4x512xf32>
    %4 = arith.addf %2, %3 : vector<4x512xf32>
    %c0_5 = arith.constant 0 : index
    %c0_6 = arith.constant 0 : index
    %5 = vector.load %arg4[%c0_5, %c0_6] : memref<4x512xf32, #tpu.memory_space<vmem>>, vector<4x512xf32>
    tpu.vector_store %arg4[%c0_5, %c0_6], %4 {strides = array<i32>} : memref<4x512xf32, #tpu.memory_space<vmem>>, vector<4x512xf32>,
    return
  }
  func.func @transform_0(%arg0: i32) -> (i32, i32) {
    %c0_i32 = arith.constant 0 : i32
    %c0_i32_0 = arith.constant 0 : i32
    return %arg0, %c0_i32 : i32, i32
  }
  func.func @transform_1(%arg0: i32) -> (i32, i32) {
    %c0_i32 = arith.constant 0 : i32
    %c0_i32_0 = arith.constant 0 : i32
    return %arg0, %c0_i32 : i32, i32
  }
  func.func @transform_2(%arg0: i32) -> (i32, i32) {
    %c0_i32 = arith.constant 0 : i32
    %c0_i32_0 = arith.constant 0 : i32
    return %arg0, %c0_i32 : i32, i32
  }
  func.func @transform_3(%arg0: i32) -> (i32, i32) {
    %c0_i32 = arith.constant 0 : i32
    %c0_i32_0 = arith.constant 0 : i32
    return %arg0, %c0_i32 : i32, i32
  }
}

</mosaic_0001>

<bundles_post_ra>
// kernel: tpu_custom_call.1
= control target key start
LH: loop header
LB: loop body
LE: loop exit
PB: predicated region body
PF: predicated region fallthrough
CT: control target
= control target key end

     0   :  { %8 = vsyncpa [#allocation3], 0  ;;  %s228_s0 = inlined_call_operand.hbm [shape: f32[4,512], index: 0, kind: input, shape index: {}]   ;;  %s229_s1 = inlined_call_operand.hbm [shape: f32[4,512], index: 1, kind: input, shape index: {}]   ;;  %s230_s2 = inlined_call_operand.hbm [shape: f32[4,512], index: 2, kind: input, shape index: {}]   ;;  %s231_s3 = inlined_call_operand.hbm [shape: f32[4,512], index: 3, kind: output, shape index: {}]  }
   0x1   :  { %9 = vsyncpa [#allocation6], 0  ;;  %s27_s14 = sshll.u32 %s229_s1, 4  ;;  %s28_s14 = int_to_ptr.hbm [resolvable:$true] %s27_s14 }
   0x2   :  { %10 = vsyncpa [#allocation4], 0  ;;  %s192_s15 = smov [#allocation5]   ;;  %s16_s19 = sshll.u32 %s228_s0, 4  ;;  %s17_s19 = int_to_ptr.hbm [resolvable:$true] %s16_s19 }
   0x3   :  { %s29_s16 = sshll.u32 %s192_s15, 4  ;;  %s193_s20 = smov [#allocation2]   ;;  %s30_s16 = int_to_ptr.vmem [resolvable:$true] %s29_s16 }
   0x4   :  { %32 = dma.hbm_to_vmem [thread:$0]  %s28_s14, 256, %s30_s16, [#allocation6]  }
   0x5   :  { %s18_s21 = sshll.u32 %s193_s20, 4  ;;  %s38_s24 = sshll.u32 %s230_s2, 4  ;;  %s19_s21 = int_to_ptr.vmem [resolvable:$true] %s18_s21  ;;  %s39_s24 = int_to_ptr.hbm [resolvable:$true] %s38_s24 }
   0x6   :  { %21 = dma.hbm_to_vmem [thread:$0]  %s17_s19, 256, %s19_s21, [#allocation3]  }
   0x7   :  { %s194_s1 = smov [#allocation7]  }
   0x8   :  { %s40_s25 = sshll.u32 %s194_s1, 4  ;;  %s41_s25 = int_to_ptr.vmem [resolvable:$true] %s40_s25 }
   0x9   :  { %43 = dma.hbm_to_vmem [thread:$0]  %s39_s24, 256, %s41_s25, [#allocation6]  }
   0xa   :  { %186 = dma.done.wait [#allocation3], 256  }
   0xb   :  { %187 = vsyncadd [#allocation3], 4294967040 }
   0xc   :  { %188 = dma.done.wait [#allocation6], 512  }
   0xd   :  { %189 = vsyncadd [#allocation6], 4294966784  ;;  %v56_v0 = vld [vmem:[#allocation2] sm:$0xff]  ;;  %v58_v1 = vld [vmem:[#allocation5] sm:$0xff]  ;;  %s195_s0 = smov [#allocation8]   ;;  %s75_s28 = sshll.u32 %s231_s3, 4  ;;  %s76_s28 = int_to_ptr.hbm [resolvable:$true] %s75_s28 }
   0xe   :  { %v62_v2 = vld [vmem:[#allocation7] sm:$0xff]  ;;  %v60_v3 = vadd.f32 %v58_v1, %v56_v0  ;;  %v57_v4 = vld [vmem:[#allocation2 + $0x8] sm:$0xff]  ;;  %v59_v5 = vld [vmem:[#allocation5 + $0x8] sm:$0xff]  ;;  %s73_s2 = sshll.u32 %s195_s0, 4  ;;  %s74_s2 = int_to_ptr.vmem [resolvable:$true] %s73_s2 }
   0xf   :  { %v63_v6 = vld [vmem:[#allocation7 + $0x8] sm:$0xff]  ;;  %v61_v7 = vadd.f32 %v59_v5, %v57_v4 }
  0x10   :  { %v64_v8 = vadd.f32 %v62_v2, %v60_v3 }
  0x11   :  { %v65_v9 = vadd.f32 %v63_v6, %v61_v7 }
  0x12   :  { %66 = vst [vmem:[#allocation8] sm:$0xff] %v64_v8 }
  0x13   :  { %67 = vst [vmem:[#allocation8 + $0x8] sm:$0xff] %v65_v9 }
  0x14   :  { %78 = dma.vmem_to_hbm [thread:$0]  %s74_s2, 256, %s76_s28, [#allocation4]  }
  0x15   :  { %190 = dma.done.wait [#allocation4], 256  }
  0x16   :  { %191 = vsyncadd [#allocation4], 4294967040 }
  0x17   :  { %83 = vsyncpa [#allocation3], 1 }
  0x18   :  { %84 = vsyncpa [#allocation6], 1 }
  0x19   :  { %85 = vsyncpa [#allocation4], 1 }

</bundles_post_ra>
